<compile_context>
chip_gen: v5e
topology: v5e:2x2
jax: 0.10.0
libtpu: 0.0.40
codegen_flags: <defaults>
</compile_context>

<pallas_src>
import functools
import math

import jax
import jax.numpy as jnp
from jax.experimental import pallas as pl
from jax.experimental.pallas import tpu as pltpu

_LANE = 128
_SUBLANE = 8


def _round_up(n, m):
    return ((n + m - 1) // m) * m


def _cdiv(a, b):
    return -(-a // b)


def _dqn_kernel(x_ref,
                w1_ref, b1_ref,
                w2_ref, b2_ref,
                w3_ref, b3_ref,
                w4_ref, b4_ref,
                wo_ref, bo_ref,
                out_ref):
    """Fused 5-layer MLP on one (tile_b, ...) batch tile.

    bf16 operands into the MXU, f32 accumulation; bias add + ReLU in f32 on
    the VPU so the same kernel runs on v5e/v6e/v7x.  fc4 / the output head are
    zero-padded to 128 lanes, so every intermediate is lane-dense.
    """
    x = x_ref[...].astype(jnp.bfloat16)

    h = jnp.dot(x, w1_ref[...], preferred_element_type=jnp.float32) + b1_ref[...]
    h = jnp.maximum(h, 0.0)

    h = jnp.dot(h.astype(jnp.bfloat16), w2_ref[...],
                preferred_element_type=jnp.float32) + b2_ref[...]
    h = jnp.maximum(h, 0.0)

    h = jnp.dot(h.astype(jnp.bfloat16), w3_ref[...],
                preferred_element_type=jnp.float32) + b3_ref[...]
    h = jnp.maximum(h, 0.0)

    h = jnp.dot(h.astype(jnp.bfloat16), w4_ref[...],
                preferred_element_type=jnp.float32) + b4_ref[...]
    h = jnp.maximum(h, 0.0)

    q = jnp.dot(h.astype(jnp.bfloat16), wo_ref[...],
                preferred_element_type=jnp.float32) + bo_ref[...]
    out_ref[...] = q.astype(out_ref.dtype)   # bf16 lane-dense store


def _const_spec(shape):
    # Whole array as one block, same block index for every grid step -> loaded
    # once and kept resident in VMEM across the batch loop.
    return pl.BlockSpec(shape, lambda i: tuple(0 for _ in shape))


def prepare_dqn_params(params):
    """One-time conversion of f32 params ([in,out] / [1,out]) into kernel layout.

    Call once at model build / weight-update time, NOT per forward pass.
    """
    action_size = params["wo"].shape[1]
    n_out_pad = _round_up(max(action_size, _LANE), _LANE)

    # fc4: pad 64 output units -> 128 lanes (zeros stay zero through ReLU).
    w4 = jnp.zeros((128, 128), jnp.bfloat16)
    w4 = w4.at[:, :64].set(params["w4"].astype(jnp.bfloat16))
    b4 = jnp.zeros((1, 128), jnp.float32)
    b4 = b4.at[:, :64].set(params["b4"])

    # Output head: pad input rows 64 -> 128 (zero rows contribute nothing) and
    # output columns action_size -> 128 for a lane-dense store.
    wo = jnp.zeros((128, n_out_pad), jnp.bfloat16)
    wo = wo.at[:64, :action_size].set(params["wo"].astype(jnp.bfloat16))
    bo = jnp.zeros((1, n_out_pad), jnp.float32)
    bo = bo.at[:, :action_size].set(params["bo"])

    return {
        "w1": params["w1"].astype(jnp.bfloat16), "b1": params["b1"],
        "w2": params["w2"].astype(jnp.bfloat16), "b2": params["b2"],
        "w3": params["w3"].astype(jnp.bfloat16), "b3": params["b3"],
        "w4": w4, "b4": b4,
        "wo": wo, "bo": bo,
    }


@functools.partial(jax.jit, static_argnames=("action_size", "max_tile_b"))
def dqn_forward(x, prepped, action_size, max_tile_b=1024):
    """x: [B, state_size] float32.  prepped: output of prepare_dqn_params."""
    B, state_size = x.shape
    n_out_pad = prepped["wo"].shape[1]

    # --- batch tiling ---------------------------------------------------
    # Right-size the tile: aim for >= 2 grid steps (v7x megacore sharding of
    # the "parallel" axis) and cap padding waste at <= 7 rows per tile.
    num_tiles = max(2, _cdiv(B, max_tile_b))
    tile_b = max(_SUBLANE, _round_up(_cdiv(B, num_tiles), _SUBLANE))
    b_pad = _round_up(_round_up(B, _SUBLANE), tile_b)
    grid = (b_pad // tile_b,)

    if b_pad != B:
        x = jnp.pad(x, ((0, b_pad - B), (0, 0)))

    operands = (
        x,
        prepped["w1"], prepped["b1"],
        prepped["w2"], prepped["b2"],
        prepped["w3"], prepped["b3"],
        prepped["w4"], prepped["b4"],
        prepped["wo"], prepped["bo"],
    )

    # x: full (non-padded) feature axis as the block's last dim — allowed by
    # the (8,128) rule since it equals the full array extent.
    in_specs = [pl.BlockSpec((tile_b, state_size), lambda i: (i, 0))]
    in_specs += [_const_spec(op.shape) for op in operands[1:]]
    out_specs = pl.BlockSpec((tile_b, n_out_pad), lambda i: (i, 0))

    # Advisory cost estimate so XLA schedules surrounding ops around this
    # small kernel.
    flops = 2 * b_pad * (state_size * 512 + 512 * 256 + 256 * 128
                         + 128 * 128 + 128 * n_out_pad)
    param_bytes = sum(math.prod(op.shape) * op.dtype.itemsize
                      for op in operands[1:])
    bytes_accessed = (b_pad * state_size * 4          # x (f32 read)
                      + b_pad * n_out_pad * 2         # out (bf16 write)
                      + param_bytes)
    cost = pl.CostEstimate(flops=flops, transcendentals=0,
                           bytes_accessed=bytes_accessed)

    out_pad = pl.pallas_call(
        _dqn_kernel,
        out_shape=jax.ShapeDtypeStruct((b_pad, n_out_pad), jnp.bfloat16),
        grid=grid,
        in_specs=in_specs,
        out_specs=out_specs,
        compiler_params=pltpu.CompilerParams(
            dimension_semantics=("parallel",)),
        cost_estimate=cost,
    )(*operands)

    return out_pad[:B, :action_size].astype(jnp.float32)


def init_dqn_params(key, state_size, action_size):
    """Deterministic init mirroring nn.Linear's U(-1/sqrt(fan_in), 1/sqrt(fan_in))."""
    dims = [state_size, 512, 256, 128, 64, action_size]
    names = ["1", "2", "3", "4", "o"]
    params = {}
    for name, fan_in, fan_out in zip(names, dims[:-1], dims[1:]):
        key, kw, kb = jax.random.split(key, 3)
        bound = 1.0 / jnp.sqrt(jnp.float32(fan_in))
        # layout: [in_features, out_features]  (transposed vs PyTorch)
        params[f"w{name}"] = jax.random.uniform(
            kw, (fan_in, fan_out), jnp.float32, minval=-bound, maxval=bound)
        # layout: [1, out_features] so bias is a 2-D VMEM tile
        params[f"b{name}"] = jax.random.uniform(
            kb, (1, fan_out), jnp.float32, minval=-bound, maxval=bound)
    return params


def dqn_reference(x, params):
    """Pure-JAX reference using the same bf16-operand / f32-accumulate discipline."""
    def layer(h, w, b, relu):
        y = jnp.dot(h.astype(jnp.bfloat16), w.astype(jnp.bfloat16),
                    preferred_element_type=jnp.float32) + b
        return jnp.maximum(y, 0.0) if relu else y

    h = layer(x, params["w1"], params["b1"], True)
    h = layer(h, params["w2"], params["b2"], True)
    h = layer(h, params["w3"], params["b3"], True)
    h = layer(h, params["w4"], params["b4"], True)
    return layer(h, params["wo"], params["bo"], False)


if __name__ == "__main__":
    STATE_SIZE = 32
    ACTION_SIZE = 8
    BATCH = 8

    key = jax.random.PRNGKey(0)
    key, kx = jax.random.split(key)
    params = init_dqn_params(key, STATE_SIZE, ACTION_SIZE)
    x = jax.random.normal(kx, (BATCH, STATE_SIZE), jnp.float32)

    prepped = prepare_dqn_params(params)          # one-time layout conversion
    q = dqn_forward(x, prepped, ACTION_SIZE)
    q = jax.block_until_ready(q)

    q_ref = dqn_reference(x, params)
    assert q.shape == (BATCH, ACTION_SIZE)
    # bf16 output store => allow bf16-level rounding vs the f32-output reference.
    assert jnp.allclose(q, q_ref, atol=2e-2, rtol=2e-2), "mismatch vs reference"

    print("KERNEL_OK")
</pallas_src>

<mosaic_0001>
module attributes {stable_mosaic.version = 11 : i64} {
  func.func @_dqn_kernel(%arg0: i32, %arg1: memref<8x32xf32, #tpu.memory_space<vmem>>, %arg2: memref<32x512xbf16, #tpu.memory_space<vmem>>, %arg3: memref<1x512xf32, #tpu.memory_space<vmem>>, %arg4: memref<512x256xbf16, #tpu.memory_space<vmem>>, %arg5: memref<1x256xf32, #tpu.memory_space<vmem>>, %arg6: memref<256x128xbf16, #tpu.memory_space<vmem>>, %arg7: memref<1x128xf32, #tpu.memory_space<vmem>>, %arg8: memref<128x128xbf16, #tpu.memory_space<vmem>>, %arg9: memref<1x128xf32, #tpu.memory_space<vmem>>, %arg10: memref<128x128xbf16, #tpu.memory_space<vmem>>, %arg11: memref<1x128xf32, #tpu.memory_space<vmem>>, %arg12: memref<8x128xbf16, #tpu.memory_space<vmem>>) attributes {dimension_semantics = [#tpu.dimension_semantics<parallel>], iteration_bounds = array<i64: 1>, scalar_prefetch = 0 : i64, scratch_operands = 0 : i64, tpu.core_type = #tpu.core_type<tc>, window_params = [{transform_indices = @transform_0, window_bounds = array<i64: 8, 32>}, {pipeline_mode = #tpu.pipeline_mode<synchronous>, transform_indices = @transform_1, window_bounds = array<i64: 32, 512>}, {pipeline_mode = #tpu.pipeline_mode<synchronous>, transform_indices = @transform_2, window_bounds = array<i64: 1, 512>}, {pipeline_mode = #tpu.pipeline_mode<synchronous>, transform_indices = @transform_3, window_bounds = array<i64: 512, 256>}, {pipeline_mode = #tpu.pipeline_mode<synchronous>, transform_indices = @transform_4, window_bounds = array<i64: 1, 256>}, {pipeline_mode = #tpu.pipeline_mode<synchronous>, transform_indices = @transform_5, window_bounds = array<i64: 256, 128>}, {pipeline_mode = #tpu.pipeline_mode<synchronous>, transform_indices = @transform_6, window_bounds = array<i64: 1, 128>}, {pipeline_mode = #tpu.pipeline_mode<synchronous>, transform_indices = @transform_7, window_bounds = array<i64: 128, 128>}, {pipeline_mode = #tpu.pipeline_mode<synchronous>, transform_indices = @transform_8, window_bounds = array<i64: 1, 128>}, {pipeline_mode = #tpu.pipeline_mode<synchronous>, transform_indices = @transform_9, window_bounds = array<i64: 128, 128>}, {pipeline_mode = #tpu.pipeline_mode<synchronous>, transform_indices = @transform_10, window_bounds = array<i64: 1, 128>}, {transform_indices = @transform_11, window_bounds = array<i64: 8, 128>}]} {
    %c0 = arith.constant 0 : index
    %c0_0 = arith.constant 0 : index
    %0 = vector.load %arg1[%c0, %c0_0] : memref<8x32xf32, #tpu.memory_space<vmem>>, vector<8x32xf32>
    %1 = arith.truncf %0 : vector<8x32xf32> to vector<8x32xbf16>
    %c0_1 = arith.constant 0 : index
    %c0_2 = arith.constant 0 : index
    %2 = vector.load %arg2[%c0_1, %c0_2] : memref<32x512xbf16, #tpu.memory_space<vmem>>, vector<32x512xbf16>
    %cst = arith.constant dense<0.000000e+00> : vector<8x512xf32>
    %3 = tpu.matmul %1, %2, %cst {dimension_numbers = #tpu.dot_dimension_numbers<[1], [0], [0], [1], [0, 0, 1, 1], [], []>} : vector<8x32xbf16>, vector<32x512xbf16>, vector<8x512xf32> -> vector<8x512xf32>
    %c0_3 = arith.constant 0 : index
    %c0_4 = arith.constant 0 : index
    %4 = vector.load %arg3[%c0_3, %c0_4] : memref<1x512xf32, #tpu.memory_space<vmem>>, vector<1x512xf32>
    %5 = vector.broadcast %4 : vector<1x512xf32> to vector<8x512xf32>
    %6 = arith.addf %3, %5 : vector<8x512xf32>
    %cst_5 = arith.constant 0.000000e+00 : f32
    %7 = vector.broadcast %cst_5 : f32 to vector<8x512xf32>
    %8 = arith.maximumf %6, %7 : vector<8x512xf32>
    %9 = arith.truncf %8 : vector<8x512xf32> to vector<8x512xbf16>
    %c0_6 = arith.constant 0 : index
    %c0_7 = arith.constant 0 : index
    %10 = vector.load %arg4[%c0_6, %c0_7] : memref<512x256xbf16, #tpu.memory_space<vmem>>, vector<512x256xbf16>
    %cst_8 = arith.constant dense<0.000000e+00> : vector<8x256xf32>
    %11 = tpu.matmul %9, %10, %cst_8 {dimension_numbers = #tpu.dot_dimension_numbers<[1], [0], [0], [1], [0, 0, 1, 1], [], []>} : vector<8x512xbf16>, vector<512x256xbf16>, vector<8x256xf32> -> vector<8x256xf32>
    %c0_9 = arith.constant 0 : index
    %c0_10 = arith.constant 0 : index
    %12 = vector.load %arg5[%c0_9, %c0_10] : memref<1x256xf32, #tpu.memory_space<vmem>>, vector<1x256xf32>
    %13 = vector.broadcast %12 : vector<1x256xf32> to vector<8x256xf32>
    %14 = arith.addf %11, %13 : vector<8x256xf32>
    %cst_11 = arith.constant 0.000000e+00 : f32
    %15 = vector.broadcast %cst_11 : f32 to vector<8x256xf32>
    %16 = arith.maximumf %14, %15 : vector<8x256xf32>
    %17 = arith.truncf %16 : vector<8x256xf32> to vector<8x256xbf16>
    %c0_12 = arith.constant 0 : index
    %c0_13 = arith.constant 0 : index
    %18 = vector.load %arg6[%c0_12, %c0_13] : memref<256x128xbf16, #tpu.memory_space<vmem>>, vector<256x128xbf16>
    %cst_14 = arith.constant dense<0.000000e+00> : vector<8x128xf32>
    %19 = tpu.matmul %17, %18, %cst_14 {dimension_numbers = #tpu.dot_dimension_numbers<[1], [0], [0], [1], [0, 0, 1, 1], [], []>} : vector<8x256xbf16>, vector<256x128xbf16>, vector<8x128xf32> -> vector<8x128xf32>
    %c0_15 = arith.constant 0 : index
    %c0_16 = arith.constant 0 : index
    %20 = vector.load %arg7[%c0_15, %c0_16] : memref<1x128xf32, #tpu.memory_space<vmem>>, vector<1x128xf32>
    %21 = vector.broadcast %20 : vector<1x128xf32> to vector<8x128xf32>
    %22 = arith.addf %19, %21 : vector<8x128xf32>
    %cst_17 = arith.constant 0.000000e+00 : f32
    %23 = vector.broadcast %cst_17 : f32 to vector<8x128xf32>
    %24 = arith.maximumf %22, %23 : vector<8x128xf32>
    %25 = arith.truncf %24 : vector<8x128xf32> to vector<8x128xbf16>
    %c0_18 = arith.constant 0 : index
    %c0_19 = arith.constant 0 : index
    %26 = vector.load %arg8[%c0_18, %c0_19] : memref<128x128xbf16, #tpu.memory_space<vmem>>, vector<128x128xbf16>
    %cst_20 = arith.constant dense<0.000000e+00> : vector<8x128xf32>
    %27 = tpu.matmul %25, %26, %cst_20 {dimension_numbers = #tpu.dot_dimension_numbers<[1], [0], [0], [1], [0, 0, 1, 1], [], []>} : vector<8x128xbf16>, vector<128x128xbf16>, vector<8x128xf32> -> vector<8x128xf32>
    %c0_21 = arith.constant 0 : index
    %c0_22 = arith.constant 0 : index
    %28 = vector.load %arg9[%c0_21, %c0_22] : memref<1x128xf32, #tpu.memory_space<vmem>>, vector<1x128xf32>
    %29 = vector.broadcast %28 : vector<1x128xf32> to vector<8x128xf32>
    %30 = arith.addf %27, %29 : vector<8x128xf32>
    %cst_23 = arith.constant 0.000000e+00 : f32
    %31 = vector.broadcast %cst_23 : f32 to vector<8x128xf32>
    %32 = arith.maximumf %30, %31 : vector<8x128xf32>
    %33 = arith.truncf %32 : vector<8x128xf32> to vector<8x128xbf16>
    %c0_24 = arith.constant 0 : index
    %c0_25 = arith.constant 0 : index
    %34 = vector.load %arg10[%c0_24, %c0_25] : memref<128x128xbf16, #tpu.memory_space<vmem>>, vector<128x128xbf16>
    %cst_26 = arith.constant dense<0.000000e+00> : vector<8x128xf32>
    %35 = tpu.matmul %33, %34, %cst_26 {dimension_numbers = #tpu.dot_dimension_numbers<[1], [0], [0], [1], [0, 0, 1, 1], [], []>} : vector<8x128xbf16>, vector<128x128xbf16>, vector<8x128xf32> -> vector<8x128xf32>
    %c0_27 = arith.constant 0 : index
    %c0_28 = arith.constant 0 : index
    %36 = vector.load %arg11[%c0_27, %c0_28] : memref<1x128xf32, #tpu.memory_space<vmem>>, vector<1x128xf32>
    %37 = vector.broadcast %36 : vector<1x128xf32> to vector<8x128xf32>
    %38 = arith.addf %35, %37 : vector<8x128xf32>
    %39 = arith.truncf %38 : vector<8x128xf32> to vector<8x128xbf16>
    %c0_29 = arith.constant 0 : index
    %c0_30 = arith.constant 0 : index
    %40 = vector.load %arg12[%c0_29, %c0_30] : memref<8x128xbf16, #tpu.memory_space<vmem>>, vector<8x128xbf16>
    tpu.vector_store %arg12[%c0_29, %c0_30], %39 {strides = array<i32>} : memref<8x128xbf16, #tpu.memory_space<vmem>>, vector<8x128xbf16>,
    return
  }
  func.func @transform_0(%arg0: i32) -> (i32, i32) {
    %c0_i32 = arith.constant 0 : i32
    %c0_i32_0 = arith.constant 0 : i32
    return %arg0, %c0_i32 : i32, i32
  }
  func.func @transform_1(%arg0: i32) -> (i32, i32) {
    %c0_i32 = arith.constant 0 : i32
    %c0_i32_0 = arith.constant 0 : i32
    %c0_i32_1 = arith.constant 0 : i32
    return %c0_i32, %c0_i32_0 : i32, i32
  }
  func.func @transform_2(%arg0: i32) -> (i32, i32) {
    %c0_i32 = arith.constant 0 : i32
    %c0_i32_0 = arith.constant 0 : i32
    %c0_i32_1 = arith.constant 0 : i32
    return %c0_i32, %c0_i32_0 : i32, i32
  }
  func.func @transform_3(%arg0: i32) -> (i32, i32) {
    %c0_i32 = arith.constant 0 : i32
    %c0_i32_0 = arith.constant 0 : i32
    %c0_i32_1 = arith.constant 0 : i32
    return %c0_i32, %c0_i32_0 : i32, i32
  }
  func.func @transform_4(%arg0: i32) -> (i32, i32) {
    %c0_i32 = arith.constant 0 : i32
    %c0_i32_0 = arith.constant 0 : i32
    %c0_i32_1 = arith.constant 0 : i32
    return %c0_i32, %c0_i32_0 : i32, i32
  }
  func.func @transform_5(%arg0: i32) -> (i32, i32) {
    %c0_i32 = arith.constant 0 : i32
    %c0_i32_0 = arith.constant 0 : i32
    %c0_i32_1 = arith.constant 0 : i32
    return %c0_i32, %c0_i32_0 : i32, i32
  }
  func.func @transform_6(%arg0: i32) -> (i32, i32) {
    %c0_i32 = arith.constant 0 : i32
    %c0_i32_0 = arith.constant 0 : i32
    %c0_i32_1 = arith.constant 0 : i32
    return %c0_i32, %c0_i32_0 : i32, i32
  }
  func.func @transform_7(%arg0: i32) -> (i32, i32) {
    %c0_i32 = arith.constant 0 : i32
    %c0_i32_0 = arith.constant 0 : i32
    %c0_i32_1 = arith.constant 0 : i32
    return %c0_i32, %c0_i32_0 : i32, i32
  }
  func.func @transform_8(%arg0: i32) -> (i32, i32) {
    %c0_i32 = arith.constant 0 : i32
    %c0_i32_0 = arith.constant 0 : i32
    %c0_i32_1 = arith.constant 0 : i32
    return %c0_i32, %c0_i32_0 : i32, i32
  }
  func.func @transform_9(%arg0: i32) -> (i32, i32) {
    %c0_i32 = arith.constant 0 : i32
    %c0_i32_0 = arith.constant 0 : i32
    %c0_i32_1 = arith.constant 0 : i32
    return %c0_i32, %c0_i32_0 : i32, i32
  }
  func.func @transform_10(%arg0: i32) -> (i32, i32) {
    %c0_i32 = arith.constant 0 : i32
    %c0_i32_0 = arith.constant 0 : i32
    %c0_i32_1 = arith.constant 0 : i32
    return %c0_i32, %c0_i32_0 : i32, i32
  }
  func.func @transform_11(%arg0: i32) -> (i32, i32) {
    %c0_i32 = arith.constant 0 : i32
    %c0_i32_0 = arith.constant 0 : i32
    return %arg0, %c0_i32 : i32, i32
  }
}

</mosaic_0001>

<bundles_post_ra>
// kernel: dqn_forward.1
= control target key start
LH: loop header
LB: loop body
LE: loop exit
PB: predicated region body
PF: predicated region fallthrough
CT: control target
= control target key end

     0   :  { %16 = vsyncpa [#allocation3], 0  ;;  %s1981_s0 = inlined_call_operand.hbm [shape: f32[8,32], index: 0, kind: input, shape index: {}]   ;;  %s1982_s1 = inlined_call_operand.hbm [shape: bf16[32,512], index: 1, kind: input, shape index: {}]   ;;  %s1983_s2 = inlined_call_operand.hbm [shape: f32[1,512], index: 2, kind: input, shape index: {}]   ;;  %s1984_s3 = inlined_call_operand.hbm [shape: bf16[512,256], index: 3, kind: input, shape index: {}]   ;;  %s1985_s4 = inlined_call_operand.hbm [shape: f32[1,256], index: 4, kind: input, shape index: {}]   ;;  %s1986_s5 = inlined_call_operand.hbm [shape: bf16[256,128], index: 5, kind: input, shape index: {}]   ;;  %s1987_s6 = inlined_call_operand.vmem [shape: f32[1,128], index: 6, kind: input, shape index: {}]   ;;  %s1988_s7 = inlined_call_operand.hbm [shape: bf16[128,128], index: 7, kind: input, shape index: {}]   ;;  %s1989_s8 = inlined_call_operand.vmem [shape: f32[1,128], index: 8, kind: input, shape index: {}]   ;;  %s1990_s9 = inlined_call_operand.hbm [shape: bf16[128,128], index: 9, kind: input, shape index: {}]   ;;  %s1991_s10 = inlined_call_operand.vmem [shape: f32[1,128], index: 10, kind: input, shape index: {}]   ;;  %s1992_s11 = inlined_call_operand.vmem [shape: bf16[8,128], index: 11, kind: output, shape index: {}]  }
   0x1   :  { %17 = vsyncpa [#allocation5], 0 }
   0x2   :  { %18 = vsyncpa [#allocation8], 0 }
   0x3   :  { %19 = vsyncpa [#allocation11], 0  ;;  %s36_s19 = sshll.u32 %s1982_s1, 4  ;;  %s37_s19 = int_to_ptr.hbm [resolvable:$true] %s36_s19 }
   0x4   :  { %20 = vsyncpa [#allocation14], 0  ;;  %s1858_s20 = smov [#allocation4]   ;;  %s60_s24 = sshll.u32 %s1984_s3, 4  ;;  %s61_s24 = int_to_ptr.hbm [resolvable:$true] %s60_s24 }
   0x5   :  { %s38_s21 = sshll.u32 %s1858_s20, 4  ;;  %s1859_s25 = smov 256   ;;  %s39_s21 = int_to_ptr.vmem [resolvable:$true] %s38_s21 }
   0x6   :  { %s1860_s26 = smov 16   ;;  %s1861_s27 = smov [#allocation7]  }
   0x7   :  { %44 = dma.hbm_to_vmem [thread:$0]  %s37_s19, 1024, %s39_s21, [#allocation5], %s1859_s25, %s1859_s25, %s1860_s26  }
   0x8   :  { %s62_s28 = sshll.u32 %s1861_s27, 4  ;;  %s1862_s29 = smov 128   ;;  %s63_s28 = int_to_ptr.vmem [resolvable:$true] %s62_s28 }
   0x9   :  { %s1863_s30 = smov 8   ;;  %s84_s13 = sshll.u32 %s1986_s5, 4  ;;  %s85_s13 = int_to_ptr.hbm [resolvable:$true] %s84_s13 }
   0xa   :  { %68 = dma.hbm_to_vmem [thread:$0]  %s61_s24, 8192, %s63_s28, [#allocation8], %s1862_s29, %s1862_s29, %s1863_s30  }
   0xb   :  { %s1864_s14 = smov [#allocation10]   ;;  %s26_s17 = sshll.u32 %s1981_s0, 4  ;;  %s27_s17 = int_to_ptr.hbm [resolvable:$true] %s26_s17 }
   0xc   :  { %s86_s15 = sshll.u32 %s1864_s14, 4  ;;  %s1865_s18 = smov 64   ;;  %s87_s15 = int_to_ptr.vmem [resolvable:$true] %s86_s15 }
   0xd   :  { %s1866_s19 = smov 4   ;;  %s1867_s20 = smov [#allocation2]  }
   0xe   :  { %92 = dma.hbm_to_vmem [thread:$0]  %s85_s13, 2048, %s87_s15, [#allocation11], %s1865_s18, %s1865_s18, %s1866_s19  }
   0xf   :  { %s28_s21 = sshll.u32 %s1867_s20, 4  ;;  %s50_s5 = sshll.u32 %s1983_s2, 4  ;;  %s29_s21 = int_to_ptr.vmem [resolvable:$true] %s28_s21  ;;  %s51_s5 = int_to_ptr.hbm [resolvable:$true] %s50_s5 }
  0x10   :  { %31 = dma.hbm_to_vmem [thread:$0]  %s27_s17, 128, %s29_s21, [#allocation3]  }
  0x11   :  { %s74_s0 = sshll.u32 %s1985_s4, 4  ;;  %s1868_s26 = smov [#allocation6]   ;;  %s75_s0 = int_to_ptr.hbm [resolvable:$true] %s74_s0 }
  0x12   :  { %s52_s27 = sshll.u32 %s1868_s26, 4  ;;  %s1869_s28 = smov [#allocation9]   ;;  %s53_s27 = int_to_ptr.vmem [resolvable:$true] %s52_s27 }
  0x13   :  { %55 = dma.hbm_to_vmem [thread:$0]  %s51_s5, 64, %s53_s27, [#allocation5]  }
  0x14   :  { %s76_s29 = sshll.u32 %s1869_s28, 4  ;;  %s99_s12 = sshll.u32 %s1988_s7, 4  ;;  %s77_s29 = int_to_ptr.vmem [resolvable:$true] %s76_s29  ;;  %s100_s12 = int_to_ptr.hbm [resolvable:$true] %s99_s12 }
  0x15   :  { %79 = dma.hbm_to_vmem [thread:$0]  %s75_s0, 32, %s77_s29, [#allocation8]  }
  0x16   :  { %s114_s14 = sshll.u32 %s1990_s9, 4  ;;  %s1870_s15 = smov [#allocation12]   ;;  %s115_s14 = int_to_ptr.hbm [resolvable:$true] %s114_s14 }
  0x17   :  { %s101_s4 = sshll.u32 %s1870_s15, 4  ;;  %s1871_s16 = smov [#allocation13]   ;;  %s102_s4 = int_to_ptr.vmem [resolvable:$true] %s101_s4 }
  0x18   :  { %107 = dma.hbm_to_vmem [thread:$0]  %s100_s12, 1024, %s102_s4, [#allocation11], %s1865_s18, %s1865_s18, %s1866_s19  }
  0x19   :  { %s116_s3 = sshll.u32 %s1871_s16, 4  ;;  %s117_s3 = int_to_ptr.vmem [resolvable:$true] %s116_s3 }
  0x1a   :  { %122 = dma.hbm_to_vmem [thread:$0]  %s115_s14, 1024, %s117_s3, [#allocation14], %s1865_s18, %s1865_s18, %s1866_s19  }
  0x1b   :  { %1848 = dma.done.wait [#allocation3], 128  }
  0x1c   :  { %1849 = vsyncadd [#allocation3], 4294967168 }
  0x1d   :  { %1850 = dma.done.wait [#allocation5], 1088  }
  0x1e   :  { %1851 = vsyncadd [#allocation5], 4294966208 }
  0x1f   :  { %1852 = dma.done.wait [#allocation8], 8224  }
  0x20   :  { %1853 = vsyncadd [#allocation8], 4294959072 }
  0x21   :  { %1854 = dma.done.wait [#allocation11], 3072  }
  0x22   :  { %1855 = vsyncadd [#allocation11], 4294964224 }
  0x23   :  { %1856 = dma.done.wait [#allocation14], 1024  }
  0x24   :  { %1857 = vsyncadd [#allocation14], 4294966272  ;;  %v1133_v0 = vld [vmem:[#allocation4 + $0x20] sm:$0xf]  ;;  %v1541_v1 = vld [vmem:[#allocation4 + $0x2c] sm:$0xf0] }
  0x25   :  { %v1539_v2 = vld [vmem:[#allocation4 + $0x24] sm:$0xf]  ;;  %v1134_v3 = vor.u32 %v1541_v1, %v1133_v0  ;;  %v1135_v4 = vld [vmem:[#allocation4 + $0x30] sm:$0xf0]  ;;  %v1141_v5 = vld [vmem:[#allocation4 + $0x28] sm:$0xf] }
  0x26   :  { %v1542_v6 = vld [vmem:[#allocation4 + $0x34] sm:$0xf0]  ;;  %v1138_v7 = vor.u32 %v1539_v2, %v1135_v4  ;;  %v1540_v9 = vld [vmem:[#allocation4 + $0x2c] sm:$0xf]  ;;  %v1143_v10 = vld [vmem:[#allocation4 + $0x38] sm:$0xf0] }
  0x27   :  { %v1142_v8 = vor.u32 %v1542_v6, %v1141_v5  ;;  %v1117_v11 = vld [vmem:[#allocation4] sm:$0xf]  ;;  %228 = vmatpush.bf16.msra.mxu0 %v1134_v3  ;;  %v1146_v12 = vor.u32 %v1540_v9, %v1143_v10  ;;  %v1537_v13 = vld [vmem:[#allocation4 + $0xc] sm:$0xf0]  ;;  %v1535_v14 = vld [vmem:[#allocation4 + $0x4] sm:$0xf] }
  0x28   :  { %v1119_v15 = vld [vmem:[#allocation4 + $0x10] sm:$0xf0]  ;;  %241 = vmatpush.bf16.msra.mxu1 %v1138_v7  ;;  %v1118_v16 = vor.u32 %v1537_v13, %v1117_v11  ;;  %v1125_v18 = vld [vmem:[#allocation4 + $0x8] sm:$0xf]  ;;  %v1538_v19 = vld [vmem:[#allocation4 + $0x14] sm:$0xf0] }
  0x29   :  { %254 = vmatpush.bf16.msra.mxu2 %v1142_v8  ;;  %v1122_v17 = vor.u32 %v1535_v14, %v1119_v15  ;;  %v1536_v20 = vld [vmem:[#allocation4 + $0xc] sm:$0xf]  ;;  %267 = vmatpush.bf16.msra.mxu3 %v1146_v12  ;;  %v1126_v21 = vor.u32 %v1538_v19, %v1125_v18  ;;  %v1127_v22 = vld [vmem:[#allocation4 + $0x18] sm:$0xf0]  ;;  %vm218_vm0 = vcmask 261120  }
  0x2a   :  { %v158_v23 = vld [vmem:[#allocation2] sm:$0xff]  ;;  %v1209_v24 = vld [vmem:[#allocation7 + $0x70] sm:$0xf]  ;;  %v1130_v25 = vor.u32 %v1536_v20, %v1127_v22  ;;  %v1201_v32 = vld [vmem:[#allocation7 + $0x60] sm:$0xf] }
  0x2b   :  { %v159_v26 = vpack.c.bf16 %v158_v23, %v158_v23  ;;  %v1558_v27 = vld [vmem:[#allocation7 + $0x74] sm:$0xf0]  ;;  %v1273_v28 = vld [vmem:[#allocation7 + $0xf0] sm:$0xf]  ;;  %229 = vmatpush.bf16.msra.mxu0 %v1118_v16  ;;  %v1556_v33 = vld [vmem:[#allocation7 + $0x64] sm:$0xf0] }
  0x2c   :  { %v1574_v29 = vld [vmem:[#allocation7 + $0xf4] sm:$0xf0]  ;;  %v1210_v30 = vor.u32 %v1558_v27, %v1209_v24  ;;  %v1265_v34 = vld [vmem:[#allocation7 + $0xe0] sm:$0xf]  ;;  %242 = vmatpush.bf16.msra.mxu1 %v1122_v17  ;;  %v1572_v35 = vld [vmem:[#allocation7 + $0xe4] sm:$0xf0]  ;;  %v1202_v38 = vor.u32 %v1556_v33, %v1201_v32 }
  0x2d   :  { %v1274_v31 = vor.u32 %v1574_v29, %v1273_v28  ;;  %255 = vmatpush.bf16.msra.mxu2 %v1126_v21  ;;  %v1337_v36 = vld [vmem:[#allocation7 + $0x170] sm:$0xf]  ;;  %v1590_v37 = vld [vmem:[#allocation7 + $0x174] sm:$0xf0]  ;;  %268 = vmatpush.bf16.msra.mxu3 %v1130_v25  ;;  %v1266_v43 = vor.u32 %v1572_v35, %v1265_v34  ;;  %v1329_v48 = vld [vmem:[#allocation7 + $0x160] sm:$0xf] }
  0x2e   :  { %v1338_v39 = vor.u32 %v1590_v37, %v1337_v36  ;;  %v1401_v40 = vld [vmem:[#allocation7 + $0x1f0] sm:$0xf]  ;;  %v1606_v41 = vld [vmem:[#allocation7 + $0x1f4] sm:$0xf0]  ;;  %1147 = vmatmul.msk.bf16.vlgmr.msra.gmra.mxu0 %vm218_vm0, %v159_v26  ;;  %v1588_v49 = vld [vmem:[#allocation7 + $0x164] sm:$0xf0] }
  0x2f   :  { %672 = vmatpush.bf16.msrb.mxu0 %v1210_v30  ;;  %v1193_v42 = vld [vmem:[#allocation7 + $0x50] sm:$0xf]  ;;  %v1402_v44 = vor.u32 %v1606_v41, %v1401_v40  ;;  %v1554_v45 = vld [vmem:[#allocation7 + $0x54] sm:$0xf0]  ;;  %1148 = vmatmul.msk.bf16.vlgmr.msra.gmra.mxu1 %vm218_vm0, %v159_v26  ;;  %v1393_v50 = vld [vmem:[#allocation7 + $0x1e0] sm:$0xf]  ;;  %v1330_v51 = vor.u32 %v1588_v49, %v1329_v48 }
  0x30   :  { %685 = vmatpush.bf16.msrb.mxu1 %v1274_v31  ;;  %v1257_v46 = vld [vmem:[#allocation7 + $0xd0] sm:$0xf]  ;;  %v1570_v47 = vld [vmem:[#allocation7 + $0xd4] sm:$0xf0]  ;;  %1149 = vmatmul.msk.bf16.vlgmr.msra.gmra.mxu2 %vm218_vm0, %v159_v26  ;;  %v1604_v52 = vld [vmem:[#allocation7 + $0x1e4] sm:$0xf0]  ;;  %v1194_v53 = vor.u32 %v1554_v45, %v1193_v42 }
  0x31   :  { %1150 = vmatmul.msk.bf16.vlgmr.msra.gmra.mxu3 %vm218_vm0, %v159_v26  ;;  %698 = vmatpush.bf16.msrb.mxu2 %v1338_v39  ;;  %v1394_v54 = vor.u32 %v1604_v52, %v1393_v50  ;;  %v1185_v55 = vld [vmem:[#allocation7 + $0x40] sm:$0xf]  ;;  %v1552_v56 = vld [vmem:[#allocation7 + $0x44] sm:$0xf0]  ;;  %v1321_v57 = vld [vmem:[#allocation7 + $0x150] sm:$0xf]  ;;  %v1258_v58 = vor.u32 %v1570_v47, %v1257_v46 }
  0x32   :  { %711 = vmatpush.bf16.msrb.mxu3 %v1402_v44  ;;  %v1586_v59 = vld [vmem:[#allocation7 + $0x154] sm:$0xf0]  ;;  %v1385_v60 = vld [vmem:[#allocation7 + $0x1d0] sm:$0xf]  ;;  %v1249_v62 = vld [vmem:[#allocation7 + $0xc0] sm:$0xf]  ;;  %v1186_v1 = vor.u32 %v1552_v56, %v1185_v55 }
  0x33   :  { %673 = vmatpush.bf16.msrb.mxu0 %v1202_v38  ;;  %v1602_v61 = vld [vmem:[#allocation7 + $0x1d4] sm:$0xf0]  ;;  %v1568_v63 = vld [vmem:[#allocation7 + $0xc4] sm:$0xf0]  ;;  %v1322_v0 = vor.u32 %v1586_v59, %v1321_v57  ;;  %v1177_v3 = vld [vmem:[#allocation7 + $0x30] sm:$0xf] }
  0x34   :  { %686 = vmatpush.bf16.msrb.mxu1 %v1266_v43  ;;  %v1386_v2 = vor.u32 %v1602_v61, %v1385_v60  ;;  %v1313_v4 = vld [vmem:[#allocation7 + $0x140] sm:$0xf]  ;;  %v1584_v5 = vld [vmem:[#allocation7 + $0x144] sm:$0xf0]  ;;  %v1250_v6 = vor.u32 %v1568_v63, %v1249_v62  ;;  %v1550_v7 = vld [vmem:[#allocation7 + $0x34] sm:$0xf0] }
  0x35   :  { %699 = vmatpush.bf16.msrb.mxu2 %v1330_v51  ;;  %v1377_v8 = vld [vmem:[#allocation7 + $0x1c0] sm:$0xf]  ;;  %v1600_v9 = vld [vmem:[#allocation7 + $0x1c4] sm:$0xf0]  ;;  %v1241_v10 = vld [vmem:[#allocation7 + $0xb0] sm:$0xf]  ;;  %v1314_v12 = vor.u32 %v1584_v5, %v1313_v4  ;;  %v1178_v13 = vor.u32 %v1550_v7, %v1177_v3 }
  0x36   :  { %712 = vmatpush.bf16.msrb.mxu3 %v1394_v54  ;;  %v1566_v11 = vld [vmem:[#allocation7 + $0xb4] sm:$0xf0]  ;;  %v1378_v14 = vor.u32 %v1600_v9, %v1377_v8  ;;  %v1169_v15 = vld [vmem:[#allocation7 + $0x20] sm:$0xf]  ;;  %v1305_v16 = vld [vmem:[#allocation7 + $0x130] sm:$0xf] }
  0x37   :  { %674 = vmatpush.bf16.msrb.mxu0 %v1194_v53  ;;  %v1582_v17 = vld [vmem:[#allocation7 + $0x134] sm:$0xf0]  ;;  %v1242_v18 = vor.u32 %v1566_v11, %v1241_v10  ;;  %v1548_v19 = vld [vmem:[#allocation7 + $0x24] sm:$0xf0]  ;;  %v1369_v20 = vld [vmem:[#allocation7 + $0x1b0] sm:$0xf] }
  0x38   :  { %687 = vmatpush.bf16.msrb.mxu1 %v1258_v58  ;;  %v1598_v21 = vld [vmem:[#allocation7 + $0x1b4] sm:$0xf0]  ;;  %v1233_v22 = vld [vmem:[#allocation7 + $0xa0] sm:$0xf]  ;;  %v1564_v23 = vld [vmem:[#allocation7 + $0xa4] sm:$0xf0]  ;;  %v1306_v24 = vor.u32 %v1582_v17, %v1305_v16  ;;  %v1170_v25 = vor.u32 %v1548_v19, %v1169_v15 }
  0x39   :  { %700 = vmatpush.bf16.msrb.mxu2 %v1322_v0  ;;  %v1370_v26 = vor.u32 %v1598_v21, %v1369_v20  ;;  %v1161_v27 = vld [vmem:[#allocation7 + $0x10] sm:$0xf]  ;;  %v1297_v28 = vld [vmem:[#allocation7 + $0x120] sm:$0xf]  ;;  %v1580_v29 = vld [vmem:[#allocation7 + $0x124] sm:$0xf0]  ;;  %v1234_v30 = vor.u32 %v1564_v23, %v1233_v22 }
  0x3a   :  { %713 = vmatpush.bf16.msrb.mxu3 %v1386_v2  ;;  %v1546_v31 = vld [vmem:[#allocation7 + $0x14] sm:$0xf0]  ;;  %v1361_v32 = vld [vmem:[#allocation7 + $0x1a0] sm:$0xf]  ;;  %v1596_v33 = vld [vmem:[#allocation7 + $0x1a4] sm:$0xf0]  ;;  %v1298_v36 = vor.u32 %v1580_v29, %v1297_v28 }
  0x3b   :  { %675 = vmatpush.bf16.msrb.mxu0 %v1186_v1  ;;  %v1225_v34 = vld [vmem:[#allocation7 + $0x90] sm:$0xf]  ;;  %v1562_v35 = vld [vmem:[#allocation7 + $0x94] sm:$0xf0]  ;;  %v1153_v37 = vld [vmem:[#allocation7] sm:$0xf]  ;;  %v1162_v39 = vor.u32 %v1546_v31, %v1161_v27  ;;  %v1362_v40 = vor.u32 %v1596_v33, %v1361_v32 }
  0x3c   :  { %688 = vmatpush.bf16.msrb.mxu1 %v1250_v6  ;;  %v1544_v38 = vld [vmem:[#allocation7 + $0x4] sm:$0xf0]  ;;  %v1217_v41 = vld [vmem:[#allocation7 + $0x80] sm:$0xf]  ;;  %v1289_v43 = vld [vmem:[#allocation7 + $0x110] sm:$0xf]  ;;  %v1226_v45 = vor.u32 %v1562_v35, %v1225_v34 }
  0x3d   :  { %701 = vmatpush.bf16.msrb.mxu2 %v1314_v12  ;;  %v1560_v42 = vld [vmem:[#allocation7 + $0x84] sm:$0xf0]  ;;  %v1578_v44 = vld [vmem:[#allocation7 + $0x114] sm:$0xf0]  ;;  %v1557_v46 = vld [vmem:[#allocation7 + $0x74] sm:$0xf]  ;;  %v1154_v53 = vor.u32 %v1544_v38, %v1153_v37 }
  0x3e   :  { %714 = vmatpush.bf16.msrb.mxu3 %v1378_v14  ;;  %v1353_v47 = vld [vmem:[#allocation7 + $0x190] sm:$0xf]  ;;  %v1594_v48 = vld [vmem:[#allocation7 + $0x194] sm:$0xf0]  ;;  %v1211_v49 = vld [vmem:[#allocation7 + $0x78] sm:$0xf0]  ;;  %v1290_v52 = vor.u32 %v1578_v44, %v1289_v43  ;;  %v1218_v59 = vor.u32 %v1560_v42, %v1217_v41 }
  0x3f   :  { %676 = vmatpush.bf16.msrb.mxu0 %v1178_v13  ;;  %v1573_v50 = vld [vmem:[#allocation7 + $0xf4] sm:$0xf]  ;;  %v1275_v51 = vld [vmem:[#allocation7 + $0xf8] sm:$0xf0]  ;;  %v1354_v54 = vor.u32 %v1594_v48, %v1353_v47  ;;  %v1555_v55 = vld [vmem:[#allocation7 + $0x64] sm:$0xf]  ;;  %v1214_v60 = vor.u32 %v1557_v46, %v1211_v49 }
  0x40   :  { %689 = vmatpush.bf16.msrb.mxu1 %v1242_v18  ;;  %v1281_v56 = vld [vmem:[#allocation7 + $0x100] sm:$0xf]  ;;  %v1576_v57 = vld [vmem:[#allocation7 + $0x104] sm:$0xf0]  ;;  %v1589_v62 = vld [vmem:[#allocation7 + $0x174] sm:$0xf]  ;;  %v1278_v0 = vor.u32 %v1573_v50, %v1275_v51 }
  0x41   :  { %702 = vmatpush.bf16.msrb.mxu2 %v1306_v24  ;;  %v1345_v58 = vld [vmem:[#allocation7 + $0x180] sm:$0xf]  ;;  %v1592_v61 = vld [vmem:[#allocation7 + $0x184] sm:$0xf0]  ;;  %v1339_v63 = vld [vmem:[#allocation7 + $0x178] sm:$0xf0]  ;;  %v1282_v6 = vor.u32 %v1576_v57, %v1281_v56 }
  0x42   :  { %715 = vmatpush.bf16.msrb.mxu3 %v1370_v26  ;;  %v1203_v1 = vld [vmem:[#allocation7 + $0x68] sm:$0xf0]  ;;  %v1605_v2 = vld [vmem:[#allocation7 + $0x1f4] sm:$0xf]  ;;  %v1403_v3 = vld [vmem:[#allocation7 + $0x1f8] sm:$0xf0]  ;;  %v1346_v7 = vor.u32 %v1592_v61, %v1345_v58  ;;  %v1342_v8 = vor.u32 %v1589_v62, %v1339_v63 }
  0x43   :  { %677 = vmatpush.bf16.msrb.mxu0 %v1170_v25  ;;  %v1571_v4 = vld [vmem:[#allocation7 + $0xe4] sm:$0xf]  ;;  %v1267_v5 = vld [vmem:[#allocation7 + $0xe8] sm:$0xf0]  ;;  %v1206_v9 = vor.u32 %v1555_v55, %v1203_v1  ;;  %v1406_v10 = vor.u32 %v1605_v2, %v1403_v3  ;;  %v1553_v12 = vld [vmem:[#allocation7 + $0x54] sm:$0xf] }
  0x44   :  { %690 = vmatpush.bf16.msrb.mxu1 %v1234_v30  ;;  %v1270_v11 = vor.u32 %v1571_v4, %v1267_v5  ;;  %v1195_v13 = vld [vmem:[#allocation7 + $0x58] sm:$0xf0]  ;;  %v1569_v14 = vld [vmem:[#allocation7 + $0xd4] sm:$0xf]  ;;  %v1587_v18 = vld [vmem:[#allocation7 + $0x164] sm:$0xf] }
  0x45   :  { %703 = vmatpush.bf16.msrb.mxu2 %v1298_v36  ;;  %v1198_v15 = vor.u32 %v1553_v12, %v1195_v13  ;;  %v1259_v16 = vld [vmem:[#allocation7 + $0xd8] sm:$0xf0]  ;;  %v1331_v19 = vld [vmem:[#allocation7 + $0x168] sm:$0xf0]  ;;  %v1603_v21 = vld [vmem:[#allocation7 + $0x1e4] sm:$0xf] }
  0x46   :  { %716 = vmatpush.bf16.msrb.mxu3 %v1362_v40  ;;  %v1262_v17 = vor.u32 %v1569_v14, %v1259_v16  ;;  %v1334_v20 = vor.u32 %v1587_v18, %v1331_v19  ;;  %v1395_v22 = vld [vmem:[#allocation7 + $0x1e8] sm:$0xf0]  ;;  %v1551_v24 = vld [vmem:[#allocation7 + $0x44] sm:$0xf]  ;;  %v1585_v30 = vld [vmem:[#allocation7 + $0x154] sm:$0xf] }
  0x47   :  { %678 = vmatpush.bf16.msrb.mxu0 %v1162_v39  ;;  %v1398_v23 = vor.u32 %v1603_v21, %v1395_v22  ;;  %v1187_v25 = vld [vmem:[#allocation7 + $0x48] sm:$0xf0]  ;;  %v1567_v26 = vld [vmem:[#allocation7 + $0xc4] sm:$0xf]  ;;  %v1323_v31 = vld [vmem:[#allocation7 + $0x158] sm:$0xf0] }
  0x48   :  { %691 = vmatpush.bf16.msrb.mxu1 %v1226_v45  ;;  %v1190_v27 = vor.u32 %v1551_v24, %v1187_v25  ;;  %v1251_v28 = vld [vmem:[#allocation7 + $0xc8] sm:$0xf0]  ;;  %v1601_v32 = vld [vmem:[#allocation7 + $0x1d4] sm:$0xf]  ;;  %v1326_v33 = vor.u32 %v1585_v30, %v1323_v31  ;;  %v1387_v34 = vld [vmem:[#allocation7 + $0x1d8] sm:$0xf0] }
  0x49   :  { %704 = vmatpush.bf16.msrb.mxu2 %v1290_v52  ;;  %v1254_v29 = vor.u32 %v1567_v26, %v1251_v28  ;;  %v1390_v35 = vor.u32 %v1601_v32, %v1387_v34  ;;  %v1549_v36 = vld [vmem:[#allocation7 + $0x34] sm:$0xf]  ;;  %v1179_v37 = vld [vmem:[#allocation7 + $0x38] sm:$0xf0]  ;;  %v1583_v42 = vld [vmem:[#allocation7 + $0x144] sm:$0xf] }
  0x4a   :  { %717 = vmatpush.bf16.msrb.mxu3 %v1354_v54  ;;  %v1182_v38 = vor.u32 %v1549_v36, %v1179_v37  ;;  %v1565_v39 = vld [vmem:[#allocation7 + $0xb4] sm:$0xf]  ;;  %v1243_v40 = vld [vmem:[#allocation7 + $0xb8] sm:$0xf0]  ;;  %v1315_v43 = vld [vmem:[#allocation7 + $0x148] sm:$0xf0] }
  0x4b   :  { %679 = vmatpush.bf16.msrb.mxu0 %v1154_v53  ;;  %v1246_v41 = vor.u32 %v1565_v39, %v1243_v40  ;;  %v1599_v44 = vld [vmem:[#allocation7 + $0x1c4] sm:$0xf]  ;;  %v1318_v45 = vor.u32 %v1583_v42, %v1315_v43  ;;  %v1379_v46 = vld [vmem:[#allocation7 + $0x1c8] sm:$0xf0]  ;;  %v1581_v54 = vld [vmem:[#allocation7 + $0x134] sm:$0xf] }
  0x4c   :  { %692 = vmatpush.bf16.msrb.mxu1 %v1218_v59  ;;  %v1382_v47 = vor.u32 %v1599_v44, %v1379_v46  ;;  %v1547_v48 = vld [vmem:[#allocation7 + $0x24] sm:$0xf]  ;;  %v1171_v49 = vld [vmem:[#allocation7 + $0x28] sm:$0xf0]  ;;  %v1307_v55 = vld [vmem:[#allocation7 + $0x138] sm:$0xf0] }
  0x4d   :  { %705 = vmatpush.bf16.msrb.mxu2 %v1282_v6  ;;  %v1563_v50 = vld [vmem:[#allocation7 + $0xa4] sm:$0xf]  ;;  %v1174_v51 = vor.u32 %v1547_v48, %v1171_v49  ;;  %v1235_v52 = vld [vmem:[#allocation7 + $0xa8] sm:$0xf0]  ;;  %v1597_v56 = vld [vmem:[#allocation7 + $0x1b4] sm:$0xf]  ;;  %v1310_v57 = vor.u32 %v1581_v54, %v1307_v55 }
  0x4e   :  { %718 = vmatpush.bf16.msrb.mxu3 %v1346_v7  ;;  %v1238_v53 = vor.u32 %v1563_v50, %v1235_v52  ;;  %v1371_v58 = vld [vmem:[#allocation7 + $0x1b8] sm:$0xf0]  ;;  %v1561_v62 = vld [vmem:[#allocation7 + $0x94] sm:$0xf]  ;;  %v1579_v1 = vld [vmem:[#allocation7 + $0x124] sm:$0xf] }
  0x4f   :  { %724 = vmatpush.bf16.msra.mxu0 %v1214_v60  ;;  %v1374_v59 = vor.u32 %v1597_v56, %v1371_v58  ;;  %v1545_v60 = vld [vmem:[#allocation7 + $0x14] sm:$0xf]  ;;  %v1163_v61 = vld [vmem:[#allocation7 + $0x18] sm:$0xf0]  ;;  %v1299_v2 = vld [vmem:[#allocation7 + $0x128] sm:$0xf0] }
  0x50   :  { %737 = vmatpush.bf16.msra.mxu1 %v1278_v0  ;;  %v1166_v63 = vor.u32 %v1545_v60, %v1163_v61  ;;  %v1227_v0 = vld [vmem:[#allocation7 + $0x98] sm:$0xf0]  ;;  %v1302_v4 = vor.u32 %v1579_v1, %v1299_v2  ;;  %v1595_v5 = vld [vmem:[#allocation7 + $0x1a4] sm:$0xf]  ;;  %v1363_v6 = vld [vmem:[#allocation7 + $0x1a8] sm:$0xf0] }
  0x51   :  { %750 = vmatpush.bf16.msra.mxu2 %v1342_v8  ;;  %v1230_v3 = vor.u32 %v1561_v62, %v1227_v0  ;;  %v1543_v7 = vld [vmem:[#allocation7 + $0x4] sm:$0xf]  ;;  %v1366_v8 = vor.u32 %v1595_v5, %v1363_v6  ;;  %v1577_v14 = vld [vmem:[#allocation7 + $0x114] sm:$0xf]  ;;  %v1355_v18 = vld [vmem:[#allocation7 + $0x198] sm:$0xf0] }
  0x52   :  { %763 = vmatpush.bf16.msra.mxu3 %v1406_v10  ;;  %v1559_v10 = vld [vmem:[#allocation7 + $0x84] sm:$0xf]  ;;  %v1593_v16 = vld [vmem:[#allocation7 + $0x194] sm:$0xf]  ;;  %v1283_v21 = vld [vmem:[#allocation7 + $0x108] sm:$0xf0] }
  0x53   :  { %725 = vmatpush.bf16.msra.mxu0 %v1206_v9  ;;  %v1155_v9 = vld [vmem:[#allocation7 + $0x8] sm:$0xf0]  ;;  %v1358_v19 = vor.u32 %v1593_v16, %v1355_v18  ;;  %v1591_v22 = vld [vmem:[#allocation7 + $0x184] sm:$0xf]  ;;  %v168_v25 = vld [vmem:[#allocation6] sm:$0xf] }
  0x54   :  { %738 = vmatpush.bf16.msra.mxu1 %v1270_v11  ;;  %v1219_v11 = vld [vmem:[#allocation7 + $0x88] sm:$0xf0]  ;;  %v1158_v12 = vor.u32 %v1543_v7, %v1155_v9  ;;  %v171_v28 = vperm.slane %v168_v25, 1  ;;  %v1614_v36 = vld [vmem:[#allocation10 + $0x38] sm:$0xff]  ;;  %v1613_v44 = vld [vmem:[#allocation10 + $0x30] sm:$0xff] }
  0x55   :  { %751 = vmatpush.bf16.msra.mxu2 %v1334_v20  ;;  %v1222_v13 = vor.u32 %v1559_v10, %v1219_v11  ;;  %v1575_v20 = vld [vmem:[#allocation7 + $0x104] sm:$0xf]  ;;  %v1347_v24 = vld [vmem:[#allocation7 + $0x188] sm:$0xf0]  ;;  %v1622_v55 = vld [vmem:[#allocation10 + $0x78] sm:$0xff] }
  0x56   :  { %764 = vmatpush.bf16.msra.mxu3 %v1398_v23  ;;  %v1286_v23 = vor.u32 %v1575_v20, %v1283_v21  ;;  %v1350_v26 = vor.u32 %v1591_v22, %v1347_v24  ;;  %v1612_v50 = vld [vmem:[#allocation10 + $0x28] sm:$0xff]  ;;  %v1611_v54 = vld [vmem:[#allocation10 + $0x20] sm:$0xff]  ;;  %v1610_v56 = vld [vmem:[#allocation10 + $0x18] sm:$0xff] }
  0x57   :  { %726 = vmatpush.bf16.msra.mxu0 %v1198_v15  ;;  %v1291_v15 = vld [vmem:[#allocation7 + $0x118] sm:$0xf0]  ;;  %v1621_v58 = vld [vmem:[#allocation10 + $0x70] sm:$0xff]  ;;  %v1620_v60 = vld [vmem:[#allocation10 + $0x68] sm:$0xff] }
  0x58   :  { %739 = vmatpush.bf16.msra.mxu1 %v1262_v17  ;;  %v1294_v17 = vor.u32 %v1577_v14, %v1291_v15  ;;  %v1607_v61 = vld [vmem:[#allocation10] sm:$0xff]  ;;  %v1617_v0 = vld [vmem:[#allocation10 + $0x50] sm:$0xff]  ;;  %v1616_v1 = vld [vmem:[#allocation10 + $0x48] sm:$0xff] }
  0x59   :  { %752 = vmatpush.bf16.msra.mxu2 %v1326_v33  ;;  %v1619_v62 = vld [vmem:[#allocation10 + $0x60] sm:$0xff]  ;;  %v346_v2 = vld [vmem:[#allocation9] sm:$0x3]  ;;  %v1629_v10 = vld [vmem:[#allocation12 + $0x30] sm:$0xff] }
  0x5a   :  { %765 = vmatpush.bf16.msra.mxu3 %v1390_v35  ;;  %v172_v35 = vperm.slane %v168_v25, 2  ;;  %v348_v5 = vperm.slane %v346_v2, 0  ;;  %v1615_v6 = vld [vmem:[#allocation10 + $0x40] sm:$0xff]  ;;  %v349_v21 = vperm.slane %v346_v2, 1 }
  0x5b   :  { %727 = vmatpush.bf16.msra.mxu0 %v1190_v27  ;;  %v170_v27 = vperm.slane %v168_v25, 0 }
  0x5c   :  { %740 = vmatpush.bf16.msra.mxu1 %v1254_v29 }
  0x5d   :  { %753 = vmatpush.bf16.msra.mxu2 %v1318_v45 }
  0x5e   :  { %766 = vmatpush.bf16.msra.mxu3 %v1382_v47 }
  0x5f   :  { %728 = vmatpush.bf16.msra.mxu0 %v1182_v38  ;;  %v173_v38 = vperm.slane %v168_v25, 3 }
  0x60   :  { %741 = vmatpush.bf16.msra.mxu1 %v1246_v41 }
  0x61   :  { %754 = vmatpush.bf16.msra.mxu2 %v1310_v57  ;;  %v1609_v57 = vld [vmem:[#allocation10 + $0x10] sm:$0xff] }
  0x62   :  { %767 = vmatpush.bf16.msra.mxu3 %v1374_v59  ;;  %v1608_v59 = vld [vmem:[#allocation10 + $0x8] sm:$0xff] }
  0x63   :  { %729 = vmatpush.bf16.msra.mxu0 %v1174_v51 }
  0x64   :  { %742 = vmatpush.bf16.msra.mxu1 %v1238_v53 }
  0x65   :  { %755 = vmatpush.bf16.msra.mxu2 %v1302_v4 }
  0x66   :  { %768 = vmatpush.bf16.msra.mxu3 %v1366_v8  ;;  %v1630_v8 = vld [vmem:[#allocation12 + $0x38] sm:$0xff] }
  0x67   :  { %730 = vmatpush.bf16.msra.mxu0 %v1166_v63  ;;  %v1618_v63 = vld [vmem:[#allocation10 + $0x58] sm:$0xff] }
  0x68   :  { %743 = vmatpush.bf16.msra.mxu1 %v1230_v3 }
  0x69   :  { %756 = vmatpush.bf16.msra.mxu2 %v1294_v17 }
  0x6a   :  { %769 = vmatpush.bf16.msra.mxu3 %v1358_v19 }
  0x6b   :  { %731 = vmatpush.bf16.msra.mxu0 %v1158_v12 }
  0x6c   :  { %744 = vmatpush.bf16.msra.mxu1 %v1222_v13 }
  0x6d   :  { %757 = vmatpush.bf16.msra.mxu2 %v1286_v23 }
  0x6e   :  { %770 = vmatpush.bf16.msra.mxu3 %v1350_v26 }
  0xab   :  { %v231_v29 = vpop.f32.mrf.mxu0 }
  0xac   :  { %v232_v30 = vadd.f32 %v231_v29, %v170_v27  ;;  %v244_v31 = vpop.f32.mrf.mxu1 }
  0xad   :  { %v245_v32 = vadd.f32 %v244_v31, %v171_v28 }
  0xae   :  { %v274_v33 = vmax.f32 %v232_v30, 0.0 }
  0xaf   :  { %v275_v34 = vmax.f32 %v245_v32, 0.0 }
  0xb0   :  { %v278_v37 = vpack.c.bf16 %v274_v33, %v274_v33 }
  0xb1   :  { %v279_v39 = vpack.c.bf16 %v275_v34, %v275_v34 }
  0xb2   :  { %680 = vmatmul.bf16.vlgmr.msrb.gmra.mxu0 %v278_v37 }
  0xb3   :  { %v257_v40 = vpop.f32.mrf.mxu2  ;;  %693 = vmatmul.bf16.vlgmr.msrb.gmra.mxu1 %v279_v39  ;;  %v233_v43 = vpop.f32.mrf.mxu0  ;;  %912 = vmatpush.bf16.msrb.mxu0 %v1614_v36  ;;  %v1628_v36 = vld [vmem:[#allocation12 + $0x28] sm:$0xff] }
  0xb4   :  { %v258_v41 = vadd.f32 %v257_v40, %v172_v35  ;;  %v270_v42 = vpop.f32.mrf.mxu3  ;;  %v246_v46 = vpop.f32.mrf.mxu1  ;;  %925 = vmatpush.bf16.msrb.mxu1 %v1622_v55  ;;  %v1624_v40 = vld [vmem:[#allocation12 + $0x8] sm:$0xff]  ;;  %v1637_v43 = vld [vmem:[#allocation13 + $0x30] sm:$0xff] }
  0xb5   :  { %v271_v45 = vadd.f32 %v270_v42, %v173_v38  ;;  %v1626_v38 = vld [vmem:[#allocation12 + $0x18] sm:$0xff]  ;;  %v1635_v46 = vld [vmem:[#allocation13 + $0x20] sm:$0xff] }
  0xb6   :  { %v276_v47 = vmax.f32 %v258_v41, 0.0  ;;  %v1623_v41 = vld [vmem:[#allocation12] sm:$0xff]  ;;  %v1638_v42 = vld [vmem:[#allocation13 + $0x38] sm:$0xff] }
  0xb7   :  { %v277_v48 = vmax.f32 %v271_v45, 0.0  ;;  %913 = vmatpush.bf16.msrb.mxu0 %v1613_v44  ;;  %v1636_v44 = vld [vmem:[#allocation13 + $0x28] sm:$0xff] }
  0xb8   :  { %v280_v49 = vpack.c.bf16 %v276_v47, %v276_v47  ;;  %926 = vmatpush.bf16.msrb.mxu1 %v1621_v58  ;;  %v1634_v47 = vld [vmem:[#allocation13 + $0x18] sm:$0xff]  ;;  %v1631_v58 = vld [vmem:[#allocation13] sm:$0xff] }
  0xb9   :  { %v281_v51 = vpack.c.bf16 %v277_v48, %v277_v48 }
  0xba   :  { %706 = vmatmul.bf16.vlgmr.msrb.gmra.mxu2 %v280_v49 }
  0xbb   :  { %719 = vmatmul.bf16.vlgmr.msrb.gmra.mxu3 %v281_v51  ;;  %v259_v52 = vpop.f32.mrf.mxu2  ;;  %914 = vmatpush.bf16.msrb.mxu0 %v1612_v50  ;;  %v1653_v50 = vld [vmem:[%s1987_s6] ss:$0 sm:$0xff] }
  0xbc   :  { %v272_v53 = vpop.f32.mrf.mxu3  ;;  %927 = vmatpush.bf16.msrb.mxu1 %v1620_v60  ;;  %1008 = vmatpush.bf16.msrb.mxu2 %v1630_v8 }
  0xbd   :  { %1091 = vmatpush.bf16.msrb.mxu3 %v1638_v42 }
  0xbf   :  { %915 = vmatpush.bf16.msrb.mxu0 %v1611_v54 }
  0xc0   :  { %928 = vmatpush.bf16.msrb.mxu1 %v1619_v62  ;;  %1009 = vmatpush.bf16.msrb.mxu2 %v1629_v10 }
  0xc1   :  { %1092 = vmatpush.bf16.msrb.mxu3 %v1637_v43 }
  0xc2   :  { %732 = vmatmul.bf16.vlgmr.msra.gmra.mxu0 %v278_v37  ;;  %v1627_v37 = vld [vmem:[#allocation12 + $0x20] sm:$0xff] }
  0xc3   :  { %745 = vmatmul.bf16.vlgmr.msra.gmra.mxu1 %v279_v39  ;;  %916 = vmatpush.bf16.msrb.mxu0 %v1610_v56  ;;  %v1625_v39 = vld [vmem:[#allocation12 + $0x10] sm:$0xff] }
  0xc4   :  { %929 = vmatpush.bf16.msrb.mxu1 %v1618_v63  ;;  %1010 = vmatpush.bf16.msrb.mxu2 %v1628_v36 }
  0xc5   :  { %1093 = vmatpush.bf16.msrb.mxu3 %v1636_v44 }
  0xc7   :  { %917 = vmatpush.bf16.msrb.mxu0 %v1609_v57  ;;  %v1632_v57 = vld [vmem:[#allocation13 + $0x8] sm:$0xff] }
  0xc8   :  { %930 = vmatpush.bf16.msrb.mxu1 %v1617_v0  ;;  %1011 = vmatpush.bf16.msrb.mxu2 %v1627_v37 }
  0xc9   :  { %1094 = vmatpush.bf16.msrb.mxu3 %v1635_v46 }
  0xca   :  { %758 = vmatmul.bf16.vlgmr.msra.gmra.mxu2 %v280_v49  ;;  %v1633_v49 = vld [vmem:[#allocation13 + $0x10] sm:$0xff] }
  0xcb   :  { %771 = vmatmul.bf16.vlgmr.msra.gmra.mxu3 %v281_v51  ;;  %918 = vmatpush.bf16.msrb.mxu0 %v1608_v59  ;;  %v1654_v59 = vld [vmem:[%s1989_s8] ss:$0 sm:$0xff] }
  0xcc   :  { %931 = vmatpush.bf16.msrb.mxu1 %v1616_v1  ;;  %1012 = vmatpush.bf16.msrb.mxu2 %v1626_v38  ;;  %v1655_v1 = vld [vmem:[%s1991_s10] ss:$0 sm:$0xff] }
  0xcd   :  { %1095 = vmatpush.bf16.msrb.mxu3 %v1634_v47 }
  0xcf   :  { %919 = vmatpush.bf16.msrb.mxu0 %v1607_v61 }
  0xd0   :  { %932 = vmatpush.bf16.msrb.mxu1 %v1615_v6  ;;  %1013 = vmatpush.bf16.msrb.mxu2 %v1625_v39 }
  0xd1   :  { %1096 = vmatpush.bf16.msrb.mxu3 %v1633_v49 }
  0xd4   :  { %1014 = vmatpush.bf16.msrb.mxu2 %v1624_v40 }
  0xd5   :  { %1097 = vmatpush.bf16.msrb.mxu3 %v1632_v57 }
  0xd8   :  { %1015 = vmatpush.bf16.msrb.mxu2 %v1623_v41 }
  0xd9   :  { %1098 = vmatpush.bf16.msrb.mxu3 %v1631_v58 }
 0x12f   :  { %v681_v3 = vpop.f32.mrf.mxu0 }
 0x130   :  { %v694_v4 = vpop.f32.mrf.mxu1  ;;  %v682_v7 = vadd.f32 %v681_v3, %v348_v5 }
 0x132   :  { %v695_v12 = vadd.f32 %v694_v4, %v682_v7 }
 0x137   :  { %v683_v9 = vpop.f32.mrf.mxu0 }
 0x138   :  { %v696_v11 = vpop.f32.mrf.mxu1 }
 0x13d   :  { %v707_v13 = vpop.f32.mrf.mxu2 }
 0x13e   :  { %v708_v14 = vadd.f32 %v707_v13, %v695_v12  ;;  %v720_v15 = vpop.f32.mrf.mxu3 }
 0x13f   :  { %v733_v17 = vpop.f32.mrf.mxu0 }
 0x140   :  { %v721_v16 = vadd.f32 %v720_v15, %v708_v14  ;;  %v746_v18 = vpop.f32.mrf.mxu1  ;;  %v734_v24 = vadd.f32 %v733_v17, %v349_v21 }
 0x142   :  { %v776_v19 = vmax.f32 %v721_v16, 0.0  ;;  %v747_v27 = vadd.f32 %v746_v18, %v734_v24 }
 0x144   :  { %v778_v20 = vpack.c.bf16 %v776_v19, %v776_v19 }
 0x145   :  { %v709_v22 = vpop.f32.mrf.mxu2 }
 0x146   :  { %v722_v23 = vpop.f32.mrf.mxu3  ;;  %920 = vmatmul.bf16.vlgmr.msrb.gmra.mxu0 %v778_v20 }
 0x147   :  { %v735_v25 = vpop.f32.mrf.mxu0 }
 0x148   :  { %v748_v26 = vpop.f32.mrf.mxu1 }
 0x14d   :  { %v759_v28 = vpop.f32.mrf.mxu2 }
 0x14e   :  { %v760_v29 = vadd.f32 %v759_v28, %v747_v27  ;;  %v772_v30 = vpop.f32.mrf.mxu3 }
 0x150   :  { %v773_v31 = vadd.f32 %v772_v30, %v760_v29 }
 0x152   :  { %v777_v32 = vmax.f32 %v773_v31, 0.0 }
 0x154   :  { %v779_v33 = vpack.c.bf16 %v777_v32, %v777_v32 }
 0x155   :  { %v761_v34 = vpop.f32.mrf.mxu2 }
 0x156   :  { %v774_v35 = vpop.f32.mrf.mxu3  ;;  %933 = vmatmul.bf16.vlgmr.msrb.gmra.mxu1 %v779_v33 }
 0x1c3   :  { %v921_v45 = vpop.f32.mrf.mxu0 }
 0x1c4   :  { %v922_v51 = vadd.f32 %v1653_v50, %v921_v45 }
 0x1cb   :  { %v923_v48 = vpop.f32.mrf.mxu0 }
 0x1d3   :  { %v934_v52 = vpop.f32.mrf.mxu1 }
 0x1d4   :  { %v935_v53 = vadd.f32 %v934_v52, %v922_v51 }
 0x1d6   :  { %v938_v54 = vmax.f32 %v935_v53, 0.0 }
 0x1d8   :  { %v939_v55 = vpack.c.bf16 %v938_v54, %v938_v54 }
 0x1da   :  { %1016 = vmatmul.bf16.vlgmr.msrb.gmra.mxu2 %v939_v55 }
 0x1db   :  { %v936_v56 = vpop.f32.mrf.mxu1 }
 0x25d   :  { %v1017_v60 = vpop.f32.mrf.mxu2 }
 0x25e   :  { %v1018_v61 = vadd.f32 %v1654_v59, %v1017_v60 }
 0x260   :  { %v1021_v62 = vmax.f32 %v1018_v61, 0.0 }
 0x262   :  { %v1022_v63 = vpack.c.bf16 %v1021_v62, %v1021_v62 }
 0x264   :  { %1099 = vmatmul.bf16.vlgmr.msrb.gmra.mxu3 %v1022_v63 }
 0x265   :  { %v1019_v0 = vpop.f32.mrf.mxu2 }
 0x2e7   :  { %v1100_v2 = vpop.f32.mrf.mxu3 }
 0x2e8   :  { %v1101_v3 = vadd.f32 %v1655_v1, %v1100_v2 }
 0x2ea   :  { %v1104_v4 = vpack.c.bf16 %v1101_v3, %v1101_v3 }
 0x2ec   :  { %1105 = vst [vmem:[%s1992_s11] sm:$0xf] %v1104_v4 }
 0x2ef   :  { %v1102_v5 = vpop.f32.mrf.mxu3 }
 0x2f0   :  { %1110 = vsyncpa [#allocation3], 1 }
 0x2f1   :  { %1111 = vsyncpa [#allocation5], 1 }
 0x2f2   :  { %1112 = vsyncpa [#allocation8], 1 }
 0x2f3   :  { %1113 = vsyncpa [#allocation11], 1 }
 0x2f4   :  { %1114 = vsyncpa [#allocation14], 1 }

</bundles_post_ra>
